<compile_context>
chip_gen: v6e
topology: v6e:2x2x1
jax: 0.10.0
libtpu: 0.0.40
codegen_flags: <defaults>
</compile_context>

<pallas_src>
import jax
import jax.numpy as jnp
from jax.experimental import pallas as pl
from jax.experimental.pallas import tpu as pltpu


def _round_up(x, m):
    return (x + m - 1) // m * m


# ----------------------------- Pallas kernels -----------------------------

def _fused_fwd_kernel(x_ref, w_ref, b_ref, cb_ref, out_ref, idx_ref, sq_ref):
    # x_ref : (tm, P)      bf16  patch pixels
    # w_ref : (P, K + D)   bf16  [ W_enc @ cb_n^T | W_enc ]      (folded on host)
    # b_ref : (1, K + D)   f32   [ b_enc @ cb_n^T | b_enc ]
    # cb_ref: (K, Wout)    f32   [ cb_n | cb_n @ W_dec + b_dec | 0-pad ]
    # out   : (tm, Wout)   f32   [ quant | decoded patches | 0 ]   (lane-dense)
    # idx   : (1, tm)      i32   codebook indices                  (lane-dense)
    # sq    : (1, tm)      f32   per-token sum((z_q - z_n)^2)      (lane-dense)
    K = cb_ref.shape[0]

    # One wide matmul gives both the raw similarities (cols :K) and the
    # pre-quant latent h (cols K:); bf16 operands, f32 accumulation on the MXU.
    hd = jnp.dot(x_ref[...], w_ref[...],
                 preferred_element_type=jnp.float32) + b_ref[...]      # (tm, K+D)
    dots = hd[:, :K]                                                   # h . e_k
    h = hd[:, K:]                                                      # (tm, D)

    # argmax over h.e_k == argmax over cos(z_n, e_k): normalization is a
    # positive per-row scale, so it only matters for the error term below.
    dmax = jnp.max(dots, axis=-1, keepdims=True)                       # (tm, 1)
    lane = jax.lax.broadcasted_iota(jnp.int32, dots.shape, 1)
    # first-occurrence argmax (matches torch.argmin on the distance matrix)
    idx = jnp.min(jnp.where(dots >= dmax, lane, jnp.int32(K)), axis=-1)  # (tm,)

    # One-hot gather of [codebook row | pre-folded decoded patch] in a single
    # matmul; the decoder bias is folded into cb_ref (one-hot rows sum to 1).
    onehot = (lane == idx[:, None]).astype(jnp.float32)                # (tm, K)
    out_ref[...] = jnp.dot(onehot, cb_ref[...],
                           preferred_element_type=jnp.float32)         # (tm, Wout)

    idx_ref[...] = idx[None, :].astype(jnp.int32)
    # both z_q and z_n are unit norm:  ||z_q - z_n||^2 = 2 - 2*(h.e_idx)/||h||
    inv_norm = jax.lax.rsqrt(jnp.sum(h * h, axis=-1) + 1e-12)          # (tm,)
    sq_ref[...] = (2.0 - 2.0 * dmax[:, 0] * inv_norm)[None, :]


def _decode_kernel(q_ref, w_ref, b_ref, o_ref):
    # folded post_quant_conv + decoder-stub linear (standalone decode() API)
    o_ref[...] = jnp.dot(q_ref[...], w_ref[...],
                         preferred_element_type=jnp.float32) + b_ref[...]


def fused_forward_call(flat, w_wide, b_wide, cb_cat, tm):
    M_pad, P = flat.shape
    KD = w_wide.shape[1]
    K, Wout = cb_cat.shape
    return pl.pallas_call(
        _fused_fwd_kernel,
        out_shape=(jax.ShapeDtypeStruct((M_pad, Wout), jnp.float32),
                   jax.ShapeDtypeStruct((1, M_pad), jnp.int32),
                   jax.ShapeDtypeStruct((1, M_pad), jnp.float32)),
        grid=(M_pad // tm,),
        in_specs=[pl.BlockSpec((tm, P), lambda i: (i, 0)),     # activations: tiled over tokens
                  pl.BlockSpec((P, KD), lambda i: (0, 0)),     # wide folded weight: VMEM-resident
                  pl.BlockSpec((1, KD), lambda i: (0, 0)),     # folded bias: resident
                  pl.BlockSpec((K, Wout), lambda i: (0, 0))],  # codebook+decode slab: resident
        out_specs=(pl.BlockSpec((tm, Wout), lambda i: (i, 0)),
                   pl.BlockSpec((1, tm), lambda i: (0, i)),
                   pl.BlockSpec((1, tm), lambda i: (0, i))),
        compiler_params=pltpu.CompilerParams(
            dimension_semantics=("parallel",)),                # megacore-shardable
    )(flat, w_wide, b_wide, cb_cat)


def decode_call(q_flat, w_dec_pad, b_dec_pad, tm):
    M_pad, D = q_flat.shape
    Wout = w_dec_pad.shape[1]                                  # multiple of 128 -> unmasked stores
    return pl.pallas_call(
        _decode_kernel,
        out_shape=jax.ShapeDtypeStruct((M_pad, Wout), jnp.float32),
        grid=(M_pad // tm,),
        in_specs=[pl.BlockSpec((tm, D), lambda i: (i, 0)),
                  pl.BlockSpec((D, Wout), lambda i: (0, 0)),
                  pl.BlockSpec((1, Wout), lambda i: (0, 0))],
        out_specs=pl.BlockSpec((tm, Wout), lambda i: (i, 0)),
        compiler_params=pltpu.CompilerParams(
            dimension_semantics=("parallel",)),
    )(q_flat, w_dec_pad, b_dec_pad)


# ------------------------------- glue (JAX) --------------------------------

def patchify(x, p):
    # x: (B, C, H, W) -> (B, L, C*p*p)  with L = (H//p)*(W//p)
    B, C, H, W = x.shape
    hp, wp = H // p, W // p
    x = x.reshape(B, C, hp, p, wp, p)
    x = jnp.transpose(x, (0, 2, 4, 1, 3, 5))
    return x.reshape(B, hp * wp, C * p * p)


def unpatchify(tokens, B, C, H, W, p):
    hp, wp = H // p, W // p
    x = tokens.reshape(B, hp, wp, C, p, p)
    x = jnp.transpose(x, (0, 3, 1, 4, 2, 5))
    return x.reshape(B, C, H, W)


def l2_normalize(x, eps=1e-12):
    # NOTE: PyTorch F.normalize uses x / max(||x||, eps); differs only for
    # near-zero vectors.
    return x * jax.lax.rsqrt(jnp.sum(x * x, axis=-1, keepdims=True) + eps)


class VQModelPallas:
    """Pallas re-implementation of VQModel.forward (inference / non-noise path)."""

    # Token-tile for the grid. Multiples of 128 keep the lane-dense (1, tm)
    # index / error blocks legal when the grid has >1 step.
    _TOKEN_TILE = 512

    def __init__(self, key, *, image_size=16, in_channels=3, patch_size=4,
                 enc_embed_dim=32, dec_embed_dim=32,
                 codebook_size=256, codebook_embed_dim=8,
                 commit_loss_beta=0.25, entropy_loss_ratio=0.0,
                 vq_loss_ratio=1.0, group_size=1):
        self.image_size = image_size
        self.in_channels = in_channels
        self.patch_size = patch_size
        self.codebook_size = codebook_size
        self.codebook_embed_dim = codebook_embed_dim
        self.beta = commit_loss_beta
        self.entropy_loss_ratio = entropy_loss_ratio
        self.vq_loss_ratio = vq_loss_ratio
        self.group_size = group_size

        patch_dim = in_channels * patch_size * patch_size
        self.patch_dim = patch_dim
        ks = jax.random.split(key, 10)
        scale = 0.02
        # --- raw parameters (mirror the PyTorch module's parameterization) ---
        enc_w = scale * jax.random.normal(ks[0], (patch_dim, enc_embed_dim), jnp.float32)
        enc_b = jnp.zeros((enc_embed_dim,), jnp.float32)
        quant_w = scale * jax.random.normal(ks[1], (enc_embed_dim, codebook_embed_dim), jnp.float32)
        quant_b = scale * jax.random.normal(ks[2], (codebook_embed_dim,), jnp.float32)
        codebook = jax.random.normal(ks[3], (codebook_size, codebook_embed_dim), jnp.float32)
        post_quant_w = scale * jax.random.normal(ks[4], (codebook_embed_dim, dec_embed_dim), jnp.float32)
        post_quant_b = scale * jax.random.normal(ks[5], (dec_embed_dim,), jnp.float32)
        dec_w = scale * jax.random.normal(ks[6], (dec_embed_dim, patch_dim), jnp.float32)
        dec_b = jnp.zeros((patch_dim,), jnp.float32)
        # TODO(synk): refine_conv / noise_idx correction branch is not exercised
        #             in this eval forward; parameters kept only for fidelity.
        self.refine_w = scale * jax.random.normal(ks[7], (codebook_embed_dim, enc_embed_dim), jnp.float32)
        self.refine_b = jnp.zeros((enc_embed_dim,), jnp.float32)

        # --- pre-folded kernel operands (done ONCE, not per call) ---
        # encoder-stub + quant_conv have no nonlinearity in between -> fold (f32).
        w_enc_f = enc_w @ quant_w                                  # (P, D)
        b_enc_f = enc_b @ quant_w + quant_b                        # (D,)
        # codebook_l2_norm=True: rows are fixed at inference -> pre-normalize once.
        cb_n = l2_normalize(codebook)                              # (K, D)
        # post_quant_conv + decoder-stub fold.
        w_dec_f = post_quant_w @ dec_w                             # (D, P)
        b_dec_f = post_quant_b @ dec_w + dec_b                     # (P,)

        # Wide encode weight: one MXU matmul -> [raw dots | h].
        self.w_wide = jnp.concatenate([w_enc_f @ cb_n.T, w_enc_f], axis=1).astype(jnp.bfloat16)
        self.b_wide = jnp.concatenate([b_enc_f @ cb_n.T, b_enc_f])[None, :].astype(jnp.float32)

        # Gather slab: one-hot @ [cb_n | cb_n@W_dec + b_dec | 0-pad], width padded
        # to a multiple of 128 so the fused output stores are lane-dense.
        out_width = _round_up(codebook_embed_dim + patch_dim, 128)
        cb_dec = cb_n @ w_dec_f + b_dec_f[None, :]                 # (K, P)
        cb_cat = jnp.concatenate([cb_n, cb_dec], axis=1)           # (K, D+P)
        self.cb_cat = jnp.pad(cb_cat, ((0, 0), (0, out_width - cb_cat.shape[1]))).astype(jnp.float32)
        self.out_width = out_width
        self.codebook_n = cb_n

        # Standalone decode() weights, zero-padded to a lane-dense 128 column slab.
        p_pad = _round_up(patch_dim, 128)
        self.w_dec_pad = jnp.pad(w_dec_f, ((0, 0), (0, p_pad - patch_dim))).astype(jnp.bfloat16)
        self.b_dec_pad = jnp.pad(b_dec_f, (0, p_pad - patch_dim))[None, :].astype(jnp.float32)

    # --- tiling helper ---
    def _tile(self, M):
        if M <= 128:
            tm = _round_up(max(M, 8), 8)            # single grid step, full-extent blocks
        else:
            # multiple of 128 -> lane-dense (1, tm) blocks legal with >1 grid step;
            # target >=2 steps so v7x can shard tokens across both TensorCores.
            tm = min(self._TOKEN_TILE, _round_up((M + 1) // 2, 128))
        return tm, _round_up(M, tm)

    # --- fused encode + decode (single kernel; used by forward and encode) ---
    def _fused_encode_decode(self, x):
        B, C, H, W = x.shape
        p = self.patch_size
        # bf16 cast fused into the patchify reshape/transpose -> halves input DMA.
        tokens = patchify(x, p).astype(jnp.bfloat16)                # (B, L, P)
        L = tokens.shape[1]
        M = B * L
        flat = tokens.reshape(M, -1)

        tm, M_pad = self._tile(M)
        if M_pad != M:
            # TODO(synk): ragged last tile could be masked in-kernel instead of padded.
            flat = jnp.pad(flat, ((0, M_pad - M), (0, 0)))

        out_slab, idx_pad, sq_pad = fused_forward_call(
            flat, self.w_wide, self.b_wide, self.cb_cat, tm)

        D = self.codebook_embed_dim
        P = self.patch_dim
        quant = out_slab[:M, :D].reshape(B, L, D)
        patches = out_slab[:M, D:D + P]
        pixel_value = unpatchify(patches.reshape(B, L, P), B, C, H, W, p)

        idx_flat = idx_pad[0, :M]
        # mean((z_q - z_n)^2): per-token sums come straight from the kernel.
        sq = jnp.sum(sq_pad[0, :M]) / jnp.float32(M * D)
        vq_loss = self.vq_loss_ratio * sq            # codebook loss
        commit_loss = self.beta * sq                 # commitment loss
        entropy_loss = jnp.float32(0.0) * self.entropy_loss_ratio  # ratio == 0 path
        usage_mask = jnp.zeros((self.codebook_size,), jnp.float32).at[idx_flat].set(1.0)
        codebook_usage = jnp.mean(usage_mask)        # codebook_show_usage=True

        indices = idx_flat.reshape(B, L)
        s = -100                                     # group_size == 1 branch
        emb_loss = (vq_loss, commit_loss, entropy_loss, codebook_usage, s)
        info = (None, None, indices)
        return quant, emb_loss, info, pixel_value

    # --- encode (module API; clean / noise_idx is None path) ---
    def encode(self, x):
        quant, emb_loss, info, _ = self._fused_encode_decode(x)
        return quant, emb_loss, info

    # --- standalone decode (module API) ---
    def decode(self, quant, B, C, H, W):
        L = quant.shape[1]
        M = B * L
        q_flat = quant.reshape(M, self.codebook_embed_dim).astype(jnp.bfloat16)
        tm, M_pad = self._tile(M)
        if M_pad != M:
            q_flat = jnp.pad(q_flat, ((0, M_pad - M), (0, 0)))
        patches = decode_call(q_flat, self.w_dec_pad, self.b_dec_pad, tm)[:M, :self.patch_dim]
        return unpatchify(patches.reshape(B, L, -1), B, C, H, W, self.patch_size)

    # --- forward ---
    def forward(self, x, cur_max_token_num=None, t=None, img_size=None,
                tgt_img=None, noise_idx=None, decoder_finetune=False):
        # training-only repa / global-token losses not applicable in eval forward
        quant, diff, info, pixel_value = self._fused_encode_decode(x)
        self.quant = quant
        return pixel_value, diff, info


if __name__ == "__main__":
    key = jax.random.PRNGKey(0)
    k_model, k_x = jax.random.split(key)

    model = VQModelPallas(k_model,
                          image_size=16, in_channels=3, patch_size=4,
                          enc_embed_dim=32, dec_embed_dim=32,
                          codebook_size=256, codebook_embed_dim=8)

    x = jax.random.normal(k_x, (2, 3, 16, 16), jnp.float32)   # NCHW, like PyTorch

    pixel, diff, info = model.forward(x)
    jax.block_until_ready(pixel)
    jax.block_until_ready([d for d in diff if isinstance(d, jnp.ndarray)])
    jax.block_until_ready(info[2])

    # exercise the standalone decode() kernel path too
    pixel2 = model.decode(model.quant, *x.shape)
    jax.block_until_ready(pixel2)

    assert pixel.shape == x.shape
    assert pixel2.shape == x.shape
    assert info[2].shape == (2, (16 // 4) * (16 // 4))
    assert len(diff) == 5

    print("KERNEL_OK")
</pallas_src>

<mosaic_0001>
module attributes {stable_mosaic.version = 11 : i64} {
  func.func @_fused_fwd_kernel(%arg0: i32, %arg1: memref<32x48xbf16, #tpu.memory_space<vmem>>, %arg2: memref<48x264xbf16, #tpu.memory_space<vmem>>, %arg3: memref<1x264xf32, #tpu.memory_space<vmem>>, %arg4: memref<256x128xf32, #tpu.memory_space<vmem>>, %arg5: memref<32x128xf32, #tpu.memory_space<vmem>>, %arg6: memref<1x32xi32, #tpu.memory_space<vmem>>, %arg7: memref<1x32xf32, #tpu.memory_space<vmem>>) attributes {dimension_semantics = [#tpu.dimension_semantics<parallel>], iteration_bounds = array<i64: 1>, scalar_prefetch = 0 : i64, scratch_operands = 0 : i64, tpu.core_type = #tpu.core_type<tc>, window_params = [{transform_indices = @transform_0, window_bounds = array<i64: 32, 48>}, {pipeline_mode = #tpu.pipeline_mode<synchronous>, transform_indices = @transform_1, window_bounds = array<i64: 48, 264>}, {pipeline_mode = #tpu.pipeline_mode<synchronous>, transform_indices = @transform_2, window_bounds = array<i64: 1, 264>}, {pipeline_mode = #tpu.pipeline_mode<synchronous>, transform_indices = @transform_3, window_bounds = array<i64: 256, 128>}, {transform_indices = @transform_4, window_bounds = array<i64: 32, 128>}, {transform_indices = @transform_5, window_bounds = array<i64: 1, 32>}, {transform_indices = @transform_6, window_bounds = array<i64: 1, 32>}]} {
    %c0 = arith.constant 0 : index
    %c0_0 = arith.constant 0 : index
    %0 = vector.load %arg1[%c0, %c0_0] : memref<32x48xbf16, #tpu.memory_space<vmem>>, vector<32x48xbf16>
    %c0_1 = arith.constant 0 : index
    %c0_2 = arith.constant 0 : index
    %1 = vector.load %arg2[%c0_1, %c0_2] : memref<48x264xbf16, #tpu.memory_space<vmem>>, vector<48x264xbf16>
    %cst = arith.constant dense<0.000000e+00> : vector<32x264xf32>
    %2 = tpu.matmul %0, %1, %cst {dimension_numbers = #tpu.dot_dimension_numbers<[1], [0], [0], [1], [0, 0, 1, 1], [], []>} : vector<32x48xbf16>, vector<48x264xbf16>, vector<32x264xf32> -> vector<32x264xf32>
    %c0_3 = arith.constant 0 : index
    %c0_4 = arith.constant 0 : index
    %3 = vector.load %arg3[%c0_3, %c0_4] : memref<1x264xf32, #tpu.memory_space<vmem>>, vector<1x264xf32>
    %4 = vector.broadcast %3 : vector<1x264xf32> to vector<32x264xf32>
    %5 = arith.addf %2, %4 : vector<32x264xf32>
    %6 = vector.extract_strided_slice %5 {offsets = [0, 0], sizes = [32, 256], strides = [1, 1]} : vector<32x264xf32> to vector<32x256xf32>
    %7 = vector.extract_strided_slice %5 {offsets = [0, 256], sizes = [32, 8], strides = [1, 1]} : vector<32x264xf32> to vector<32x8xf32>
    %cst_5 = arith.constant dense<0xFF800000> : vector<32xf32>
    %8 = vector.multi_reduction <maximumf>, %6, %cst_5 [1] : vector<32x256xf32> to vector<32xf32>
    %9 = vector.shape_cast %8 : vector<32xf32> to vector<32x1xf32>
    %10 = tpu.iota {dimensions = array<i32: 1>} : vector<32x256xi32>
    %11 = vector.broadcast %9 : vector<32x1xf32> to vector<32x256xf32>
    %12 = arith.cmpf oge, %6, %11 : vector<32x256xf32>
    %c256_i32 = arith.constant 256 : i32
    %13 = vector.broadcast %c256_i32 : i32 to vector<32x256xi32>
    %14 = arith.select %12, %10, %13 : vector<32x256xi1>, vector<32x256xi32>
    %cst_6 = arith.constant dense<2147483647> : vector<32xi32>
    %15 = vector.multi_reduction <minsi>, %14, %cst_6 [1] : vector<32x256xi32> to vector<32xi32>
    %16 = vector.shape_cast %15 : vector<32xi32> to vector<32x1xi32>
    %17 = vector.broadcast %16 : vector<32x1xi32> to vector<32x256xi32>
    %18 = arith.cmpi eq, %10, %17 : vector<32x256xi32>
    %19 = arith.extui %18 : vector<32x256xi1> to vector<32x256xi32>
    %20 = arith.sitofp %19 : vector<32x256xi32> to vector<32x256xf32>
    %c0_7 = arith.constant 0 : index
    %c0_8 = arith.constant 0 : index
    %21 = vector.load %arg4[%c0_7, %c0_8] : memref<256x128xf32, #tpu.memory_space<vmem>>, vector<256x128xf32>
    %cst_9 = arith.constant dense<0.000000e+00> : vector<32x128xf32>
    %22 = tpu.matmul %20, %21, %cst_9 {dimension_numbers = #tpu.dot_dimension_numbers<[1], [0], [0], [1], [0, 0, 1, 1], [], []>} : vector<32x256xf32>, vector<256x128xf32>, vector<32x128xf32> -> vector<32x128xf32>
    %c0_10 = arith.constant 0 : index
    %c0_11 = arith.constant 0 : index
    %23 = vector.load %arg5[%c0_10, %c0_11] : memref<32x128xf32, #tpu.memory_space<vmem>>, vector<32x128xf32>
    tpu.vector_store %arg5[%c0_10, %c0_11], %22 {strides = array<i32>} : memref<32x128xf32, #tpu.memory_space<vmem>>, vector<32x128xf32>,
    %24 = vector.shape_cast %15 : vector<32xi32> to vector<1x32xi32>
    %c0_12 = arith.constant 0 : index
    %c0_13 = arith.constant 0 : index
    %25 = vector.load %arg6[%c0_12, %c0_13] : memref<1x32xi32, #tpu.memory_space<vmem>>, vector<1x32xi32>
    tpu.vector_store %arg6[%c0_12, %c0_13], %24 {strides = array<i32>} : memref<1x32xi32, #tpu.memory_space<vmem>>, vector<1x32xi32>,
    %26 = arith.mulf %7, %7 : vector<32x8xf32>
    %cst_14 = arith.constant dense<0.000000e+00> : vector<32xf32>
    %27 = vector.multi_reduction <add>, %26, %cst_14 [1] : vector<32x8xf32> to vector<32xf32>
    %cst_15 = arith.constant 9.99999996E-13 : f32
    %28 = vector.broadcast %cst_15 : f32 to vector<32xf32>
    %29 = arith.addf %27, %28 : vector<32xf32>
    %30 = math.rsqrt %29 : vector<32xf32>
    %31 = vector.shape_cast %9 : vector<32x1xf32> to vector<32xf32>
    %cst_16 = arith.constant 2.000000e+00 : f32
    %32 = vector.broadcast %cst_16 : f32 to vector<32xf32>
    %33 = arith.mulf %32, %31 : vector<32xf32>
    %34 = arith.mulf %33, %30 : vector<32xf32>
    %cst_17 = arith.constant 2.000000e+00 : f32
    %35 = vector.broadcast %cst_17 : f32 to vector<32xf32>
    %36 = arith.subf %35, %34 : vector<32xf32>
    %37 = vector.shape_cast %36 : vector<32xf32> to vector<1x32xf32>
    %c0_18 = arith.constant 0 : index
    %c0_19 = arith.constant 0 : index
    %38 = vector.load %arg7[%c0_18, %c0_19] : memref<1x32xf32, #tpu.memory_space<vmem>>, vector<1x32xf32>
    tpu.vector_store %arg7[%c0_18, %c0_19], %37 {strides = array<i32>} : memref<1x32xf32, #tpu.memory_space<vmem>>, vector<1x32xf32>,
    return
  }
  func.func @transform_0(%arg0: i32) -> (i32, i32) {
    %c0_i32 = arith.constant 0 : i32
    %c0_i32_0 = arith.constant 0 : i32
    return %arg0, %c0_i32 : i32, i32
  }
  func.func @transform_1(%arg0: i32) -> (i32, i32) {
    %c0_i32 = arith.constant 0 : i32
    %c0_i32_0 = arith.constant 0 : i32
    %c0_i32_1 = arith.constant 0 : i32
    return %c0_i32, %c0_i32_0 : i32, i32
  }
  func.func @transform_2(%arg0: i32) -> (i32, i32) {
    %c0_i32 = arith.constant 0 : i32
    %c0_i32_0 = arith.constant 0 : i32
    %c0_i32_1 = arith.constant 0 : i32
    return %c0_i32, %c0_i32_0 : i32, i32
  }
  func.func @transform_3(%arg0: i32) -> (i32, i32) {
    %c0_i32 = arith.constant 0 : i32
    %c0_i32_0 = arith.constant 0 : i32
    %c0_i32_1 = arith.constant 0 : i32
    return %c0_i32, %c0_i32_0 : i32, i32
  }
  func.func @transform_4(%arg0: i32) -> (i32, i32) {
    %c0_i32 = arith.constant 0 : i32
    %c0_i32_0 = arith.constant 0 : i32
    return %arg0, %c0_i32 : i32, i32
  }
  func.func @transform_5(%arg0: i32) -> (i32, i32) {
    %c0_i32 = arith.constant 0 : i32
    %c0_i32_0 = arith.constant 0 : i32
    return %c0_i32, %arg0 : i32, i32
  }
  func.func @transform_6(%arg0: i32) -> (i32, i32) {
    %c0_i32 = arith.constant 0 : i32
    %c0_i32_0 = arith.constant 0 : i32
    return %c0_i32, %arg0 : i32, i32
  }
}

</mosaic_0001>

<bundles_post_ra>
// kernel: tpu_custom_call.1
= control target key start
LH: loop header
LB: loop body
LE: loop exit
PB: predicated region body
PF: predicated region fallthrough
CT: control target
= control target key end

     0   :  { %12 = vsyncpa [#allocation3], 0  ;;  %s1079_s0 = inlined_call_operand.hbm [shape: bf16[32,48], index: 0, kind: input, shape index: {}]   ;;  %s1080_s1 = inlined_call_operand.hbm [shape: bf16[48,264], index: 1, kind: input, shape index: {}]   ;;  %s1081_s2 = inlined_call_operand.vmem [shape: f32[1,264], index: 2, kind: input, shape index: {}]   ;;  %s1082_s3 = inlined_call_operand.hbm [shape: f32[256,128], index: 3, kind: input, shape index: {}]   ;;  %s1083_s4 = inlined_call_operand.hbm [shape: f32[32,128], index: 4, kind: output, shape index: {0}]   ;;  %s1084_s5 = inlined_call_operand.hbm [shape: s32[1,32], index: 5, kind: output, shape index: {1}]   ;;  %s1085_s6 = inlined_call_operand.hbm [shape: f32[1,32], index: 6, kind: output, shape index: {2}]  }
   0x1   :  { %13 = vsyncpa [#allocation6], 0 }
   0x2   :  { %14 = vsyncpa [#allocation4], 0 }
   0x3   :  { %15 = vsyncpa [#allocation10], 0  ;;  %s892_s21 = smov [#allocation5]  }
   0x4   :  { %s33_s22 = sshll.u32 %s892_s21, 4  ;;  %s34_s22 = int_to_ptr.vmem [resolvable:$true] %s33_s22 }
   0x5   :  { %s772_s23 = scalar_lea.vmem %s34_s22, 1152  ;;  %p777_p1 = scmp.lt.s32.totalorder %s34_s22, %s34_s22 }
   0x6   :  { %p773_p0 = scmp.ne.s32.totalorder %s34_s22, %s772_s23  ;;  %p778_p2 = scmp.lt.s32.totalorder %s772_s23, %s772_s23 }
   0x8   :  { %p779_p3 = por %p778_p2, %p777_p1 }
   0xa   :  { %p780_p4 = pnand %p779_p3, %p773_p0 }
   0xc   :  { %783 = shalt.err (!%p780_p4)
}
   0xd   :  { %s893_s24 = smov 192   ;;  %s894_s25 = smov 12  }
   0xe   :  { %39 = dma.hbm_to_vmem [thread:$0]  %s1080_s1, 1152, %s34_s22, [#allocation6], %s893_s24, %s893_s24, %s894_s25  }
   0xf   :  { %s895_s28 = smov [#allocation2]  }
  0x10   :  { %s21_s29 = sshll.u32 %s895_s28, 4  ;;  %s22_s29 = int_to_ptr.vmem [resolvable:$true] %s21_s29 }
  0x11   :  { %s792_s30 = scalar_lea.vmem %s22_s29, 256  ;;  %p797_p6 = scmp.lt.s32.totalorder %s22_s29, %s22_s29 }
  0x12   :  { %p793_p5 = scmp.ne.s32.totalorder %s22_s29, %s792_s30  ;;  %p798_p7 = scmp.lt.s32.totalorder %s792_s30, %s792_s30 }
  0x14   :  { %p799_p8 = por %p798_p7, %p797_p6 }
  0x16   :  { %p800_p9 = pnand %p799_p8, %p793_p5 }
  0x18   :  { %803 = shalt.err (!%p800_p9)
}
  0x19   :  { %s896_s7 = smov 64   ;;  %s897_s8 = smov 4  }
  0x1a   :  { %27 = dma.hbm_to_vmem [thread:$0]  %s1079_s0, 256, %s22_s29, [#allocation3], %s896_s7, %s896_s7, %s897_s8  }
  0x1b   :  { %s898_s11 = smov [#allocation7]  }
  0x1c   :  { %s47_s12 = sshll.u32 %s898_s11, 4  ;;  %s48_s12 = int_to_ptr.vmem [resolvable:$true] %s47_s12 }
  0x1d   :  { %s812_s1 = scalar_lea.vmem %s48_s12, 4096  ;;  %p817_p11 = scmp.lt.s32.totalorder %s48_s12, %s48_s12 }
  0x1e   :  { %p813_p10 = scmp.ne.s32.totalorder %s48_s12, %s812_s1  ;;  %p818_p12 = scmp.lt.s32.totalorder %s812_s1, %s812_s1 }
  0x20   :  { %p819_p13 = por %p818_p12, %p817_p11 }
  0x22   :  { %p820_p0 = pnand %p819_p13, %p813_p10 }
  0x24   :  { %823 = shalt.err (!%p820_p0)
}
  0x25   :  { %s899_s13 = smov 128   ;;  %s900_s14 = smov 8  }
  0x26   :  { %53 = dma.hbm_to_vmem [thread:$0]  %s1082_s3, 4096, %s48_s12, [#allocation6], %s899_s13, %s899_s13, %s900_s14  }
  0x27   :  { %884 = dma.done.wait [#allocation3], 256  }
  0x28   :  { %885 = vsyncadd [#allocation3], 4294967040 }
  0x29   :  { %886 = dma.done.wait [#allocation6], 5248  }
  0x2a   :  { %887 = vsyncadd [#allocation6], 4294962048  ;;  %v901_v0 = vmov 0   ;;  %v742_v1 = vld [vmem:[#allocation5 + $0x34] ss:$12 sps:$4 sm:$0xff]   ;;  %vm155_vm0 = vcmask 392192   ;;  %v82_v12 = vlaneseq }
  0x2b   :  { %194 = vmatprep.mubr.bf16.mxu1 %v901_v0  ;;  %v744_v2 = vld [vmem:[#allocation5 + $0x30] ss:$12 sps:$4 sm:$0xff]   ;;  %172 = vmatprep.subr.bf16.mxu1 %v742_v1  ;;  %v747_v4 = vld [vmem:[#allocation5 + $0x18] ss:$12 sps:$4 sm:$0xff]   ;;  %v750_v6 = vld [vmem:[#allocation5] ss:$12 sps:$4 sm:$0xff]  }
  0x2c   :  { %v745_v3 = vld [vmem:[#allocation5 + $0x1c] ss:$12 sps:$4 sm:$0xff]   ;;  %173 = vmatpush1.bf16.msra.mxu1 %v744_v2  ;;  %v748_v5 = vld [vmem:[#allocation5 + $0x4] ss:$12 sps:$4 sm:$0xff]   ;;  %v754_v10 = vld [vmem:[#allocation5 + $0x20] ss:$12 sps:$4 sm:$0xff]  }
  0x2d   :  { %174 = vmatprep.subr.bf16.mxu1 %v745_v3  ;;  %v751_v7 = vld [vmem:[#allocation2] sm:$0xff]   ;;  %v752_v8 = vld [vmem:[#allocation2 + $0x8] sm:$0xff]   ;;  %v953_v13 = vshrl.u32 %v82_v12, 7  ;;  %v964_v39 = vand.u32 127, %v82_v12  ;;  %v414_v1 = vld [vmem:[#allocation7 + $0xf8] sm:$0xff] }
  0x2e   :  { %v753_v9 = vld [vmem:[#allocation5 + $0x38] ss:$12 sps:$4 sm:$0xff]   ;;  %v755_v11 = vld [vmem:[#allocation5 + $0x8] ss:$12 sps:$4 sm:$0xff]   ;;  %v960_v16 = vld [vmem:[%s1081_s2] sm:$0x7]  ;;  %674 = vmatprep.subr.mxu0 %v414_v1 }
  0x2f   :  { %v84_v14 = vsub.s32 0, %v953_v13  ;;  %v88_v15 = vsub.s32 1, %v953_v13  ;;  %v967_v40 = vadd.s32 128, %v964_v39  ;;  %v398_v2 = vld [vmem:[#allocation7 + $0x78] sm:$0xff]  ;;  %v413_v3 = vld [vmem:[#allocation7 + $0xf0] sm:$0xff]  ;;  %s903_s2 = smov [#allocation9]  }
  0x30   :  { %175 = vmatpush1.bf16.msra.mxu1 %v747_v4  ;;  %v397_v4 = vld [vmem:[#allocation7 + $0x70] sm:$0xff]  ;;  %675 = vmatpush3.msra.mxu0 %v398_v2  ;;  %s611_s17 = sshll.u32 %s903_s2, 4  ;;  %s612_s17 = int_to_ptr.vmem [resolvable:$true] %s611_s17 }
  0x31   :  { %176 = vmatprep.subr.bf16.mxu1 %v748_v5  ;;  %v85_v17 = vrot.slane %v960_v16, %v84_v14  ;;  %v89_v18 = vrot.slane %v960_v16, %v88_v15  ;;  %v412_v5 = vld [vmem:[#allocation7 + $0xe8] sm:$0xff]  ;;  %676 = vmatprep.subr.mxu0 %v413_v3  ;;  %v393_v12 = vld [vmem:[#allocation7 + $0x50] sm:$0xff]  ;;  %s824_s18 = scalar_lea.vmem %s612_s17, 16  ;;  %s828_s19 = scalar_lea.vmem %s612_s17, 32 }
  0x32   :  { %677 = vmatpush3.msra.mxu0 %v397_v4  ;;  %v408_v14 = vld [vmem:[#allocation7 + $0xc8] sm:$0xff]  ;;  %v385_v3 = vld [vmem:[#allocation7 + $0x10] sm:$0xff]  ;;  %p825_p1 = scmp.ne.s32.totalorder %s612_s17, %s824_s18  ;;  %p829_p2 = scmp.lt.s32.totalorder %s612_s17, %s612_s17 }
  0x33   :  { %678 = vmatprep.subr.mxu0 %v412_v5  ;;  %v392_v15 = vld [vmem:[#allocation7 + $0x48] sm:$0xff]  ;;  %p830_p3 = scmp.lt.s32.totalorder %s828_s19, %s824_s18 }
  0x34   :  { %177 = vmatpush1.bf16.msra.mxu1 %v750_v6  ;;  %v396_v6 = vld [vmem:[#allocation7 + $0x68] sm:$0xff] }
  0x35   :  { %718 = vmatprep.subr.bf16.mxu1 %v753_v9  ;;  %679 = vmatpush3.msra.mxu0 %v396_v6  ;;  %v400_v4 = vld [vmem:[#allocation7 + $0x88] sm:$0xff]  ;;  %p831_p4 = por %p830_p3, %p829_p2 }
  0x37   :  { %649 = vmatmul.mubr.msk.bf16.vlgmr.msra.gmra.mxu1 %vm155_vm0, %v751_v7  ;;  %p832_p5 = pnand %p831_p4, %p825_p1 }
  0x38   :  { %204 = vmatprep.mubr.bf16.mxu1 %v901_v0  ;;  %719 = vmatpush3.bf16.msra.mxu1 %v753_v9  ;;  %v410_v9 = vld [vmem:[#allocation7 + $0xd8] sm:$0xff] }
  0x39   :  { %720 = vmatprep.subr.bf16.mxu1 %v754_v10 }
  0x3c   :  { %721 = vmatpush3.bf16.msra.mxu1 %v754_v10  ;;  %v394_v10 = vld [vmem:[#allocation7 + $0x58] sm:$0xff] }
  0x3d   :  { %722 = vmatprep.subr.bf16.mxu1 %v755_v11 }
  0x3f   :  { %650 = vmatmul.mubr.msk.bf16.gmra.mxu1 %vm155_vm0, %v752_v8 }
  0x40   :  { %724 = vmatprep.mubr.msk.bf16.mxu1 %vm155_vm0, %v751_v7  ;;  %723 = vmatpush3.bf16.msra.mxu1 %v755_v11  ;;  %v411_v7 = vld [vmem:[#allocation7 + $0xe0] sm:$0xff]  ;;  %v409_v11 = vld [vmem:[#allocation7 + $0xd0] sm:$0xff] }
  0x41   :  { %680 = vmatprep.subr.mxu0 %v411_v7  ;;  %v384_v7 = vld [vmem:[#allocation7 + $0x8] sm:$0xff] }
  0x47   :  { %725 = vmatmul.mubr.msk.bf16.vlgmr.msra.gmra.mxu1 %vm155_vm0, %v752_v8  ;;  %v395_v8 = vld [vmem:[#allocation7 + $0x60] sm:$0xff]  ;;  %vm535_vm0 = vcmask 64512  }
  0x48   :  { %681 = vmatpush3.msra.mxu0 %v395_v8  ;;  %v399_v8 = vld [vmem:[#allocation7 + $0x80] sm:$0xff] }
  0x49   :  { %682 = vmatprep.subr.mxu0 %v410_v9  ;;  %v383_v9 = vld [vmem:[#allocation7] sm:$0xff] }
  0x4a   :  { %683 = vmatpush3.msra.mxu0 %v394_v10 }
  0x4b   :  { %684 = vmatprep.subr.mxu0 %v409_v11 }
  0x4c   :  { %685 = vmatpush3.msra.mxu0 %v393_v12 }
  0x4d   :  { %686 = vmatprep.subr.mxu0 %v408_v14 }
  0x4e   :  { %687 = vmatpush3.msra.mxu0 %v392_v15 }
  0xf7   :  { %v196_v19 = vpop.f32.mrf.mxu1 }
  0xf8   :  { %v197_v21 = vadd.f32 %v196_v19, %v85_v17  ;;  %v406_v19 = vld [vmem:[#allocation7 + $0xb8] sm:$0xff] }
  0xf9   :  { %v198_v20 = vpop.f32.mrf.mxu1 }
  0xfa   :  { %v199_v22 = vadd.f32 %v198_v20, %v89_v18  ;;  %v390_v20 = vld [vmem:[#allocation7 + $0x38] sm:$0xff] }
  0xfb   :  { %v200_v23 = vpop.f32.mrf.mxu1 }
  0xfc   :  { %v264_v24 = vmax.f32 %v197_v21, %v199_v22  ;;  %v201_v26 = vadd.f32 %v200_v23, %v85_v17  ;;  %v404_v23 = vld [vmem:[#allocation7 + $0xa8] sm:$0xff] }
  0xfd   :  { %v202_v25 = vpop.f32.mrf.mxu1 }
  0xfe   :  { %v203_v27 = vadd.f32 %v202_v25, %v89_v18  ;;  %265 = vmax.xlane.f32.xlu0 %v264_v24  ;;  %v388_v24 = vld [vmem:[#allocation7 + $0x28] sm:$0xff]  ;;  %v403_v25 = vld [vmem:[#allocation7 + $0xa0] sm:$0xff] }
  0xff   :  { %v206_v28 = vpop.f32.mrf.mxu1 }
 0x100   :  { %v267_v29 = vmax.f32 %v201_v26, %v203_v27  ;;  %v207_v31 = vadd.f32 %v206_v28, %v85_v17  ;;  %v386_v28 = vld [vmem:[#allocation7 + $0x18] sm:$0xff] }
 0x101   :  { %v208_v30 = vpop.f32.mrf.mxu1 }
 0x102   :  { %v209_v32 = vadd.f32 %v208_v30, %v89_v18  ;;  %268 = vmax.xlane.f32.xlu0 %v267_v29 }
 0x103   :  { %v210_v33 = vpop.f32.mrf.mxu1 }
 0x104   :  { %v270_v34 = vmax.f32 %v207_v31, %v209_v32  ;;  %v211_v36 = vadd.f32 %v210_v33, %v85_v17  ;;  %v407_v17 = vld [vmem:[#allocation7 + $0xc0] sm:$0xff] }
 0x105   :  { %v212_v35 = vpop.f32.mrf.mxu1  ;;  %688 = vmatprep.subr.mxu0 %v407_v17  ;;  %v508_v17 = vadd.s32 4294967288, %v964_v39 }
 0x106   :  { %v213_v37 = vadd.f32 %v212_v35, %v89_v18  ;;  %271 = vmax.xlane.f32.xlu1 %v270_v34  ;;  %v391_v18 = vld [vmem:[#allocation7 + $0x40] sm:$0xff] }
 0x107   :  { %689 = vmatpush3.msra.mxu0 %v391_v18  ;;  %v726_v29 = vpop.f32.mrf.mxu1 }
 0x108   :  { %v273_v38 = vmax.f32 %v211_v36, %v213_v37  ;;  %690 = vmatprep.subr.mxu0 %v406_v19 }
 0x109   :  { %691 = vmatpush3.msra.mxu0 %v390_v20 }
 0x10a   :  { %274 = vmax.xlane.f32.xlu1 %v273_v38 }
 0x187   :  { %v969_v41 = vpop.xlane.xlu0 %265 }
 0x188   :  { %vm279_vm1 = vcmp.ge.f32.partialorder %v197_v21, %v969_v41  ;;  %vm280_vm2 = vcmp.ge.f32.partialorder %v199_v22, %v969_v41  ;;  %v405_v21 = vld [vmem:[#allocation7 + $0xb0] sm:$0xff] }
 0x189   :  { %v287_v42 = vsel %vm279_vm1, %v964_v39, 256  ;;  %v288_v43 = vsel %vm280_vm2, %v967_v40, 256  ;;  %v389_v22 = vld [vmem:[#allocation7 + $0x30] sm:$0xff]  ;;  %692 = vmatprep.subr.mxu0 %v405_v21  ;;  %v1034_v21 = vsub.s32 %v964_v39, %v953_v13 }
 0x18a   :  { %vm295_vm3 = vcmp.lt.s32.totalorder %v287_v42, %v288_v43  ;;  %693 = vmatpush3.msra.mxu0 %v389_v22 }
 0x18b   :  { %v975_v44 = vpop.xlane.xlu0 %268  ;;  %v977_v45 = vsel %vm295_vm3, %v287_v42, %v288_v43  ;;  %694 = vmatprep.subr.mxu0 %v404_v23  ;;  %v1037_v23 = vsub.s32 %v508_v17, %v953_v13 }
 0x18c   :  { %vm281_vm4 = vcmp.ge.f32.partialorder %v201_v26, %v975_v44  ;;  %vm282_vm5 = vcmp.ge.f32.partialorder %v203_v27, %v975_v44  ;;  %v298_v46 = vshra.s32 %v977_v45, 16  ;;  %v387_v26 = vld [vmem:[#allocation7 + $0x20] sm:$0xff]  ;;  %695 = vmatpush3.msra.mxu0 %v388_v24  ;;  %v402_v27 = vld [vmem:[#allocation7 + $0x98] sm:$0xff]  ;;  %v297_v30 = vand.u32 65535, %v977_v45 }
 0x18d   :  { %v289_v47 = vsel %vm281_vm4, %v964_v39, 256  ;;  %v290_v48 = vsel %vm282_vm5, %v967_v40, 256  ;;  %696 = vmatprep.subr.mxu0 %v403_v25  ;;  %v902_v25 = vmov 1.0   ;;  %vm513_vm4 = vcmask 130112  }
 0x18e   :  { %v984_v49 = vcvt.s32.f32 %v298_v46  ;;  %vm311_vm6 = vcmp.lt.s32.totalorder %v289_v47, %v290_v48  ;;  %697 = vmatpush3.msra.mxu0 %v387_v26  ;;  %v299_v34 = vcvt.s32.f32 %v297_v30  ;;  %v515_v26 = vadd.s32 4294967280, %v964_v39 }
 0x18f   :  { %v986_v50 = vpop.xlane.xlu1 %271  ;;  %v988_v51 = vsel %vm311_vm6, %v289_v47, %v290_v48  ;;  %698 = vmatprep.subr.mxu0 %v402_v27 }
 0x190   :  { %vm283_vm7 = vcmp.ge.f32.partialorder %v207_v31, %v986_v50  ;;  %vm284_vm8 = vcmp.ge.f32.partialorder %v209_v32, %v986_v50  ;;  %301 = vmin.xlane.f32.xlu0 %v984_v49  ;;  %v314_v52 = vshra.s32 %v988_v51, 16  ;;  %699 = vmatpush3.msra.mxu0 %v386_v28  ;;  %v92_v31 = vsub.s32 2, %v953_v13  ;;  %v249_v32 = vpop.f32.mrf.mxu1 }
 0x191   :  { %v291_v53 = vsel %vm283_vm7, %v964_v39, 256  ;;  %v292_v54 = vsel %vm284_vm8, %v967_v40, 256 }
 0x192   :  { %v996_v55 = vcvt.s32.f32 %v314_v52  ;;  %vm327_vm9 = vcmp.lt.s32.totalorder %v291_v53, %v292_v54  ;;  %v93_v35 = vrot.slane %v960_v16, %v92_v31 }
 0x193   :  { %v998_v56 = vpop.xlane.xlu1 %274  ;;  %v1000_v57 = vsel %vm327_vm9, %v291_v53, %v292_v54  ;;  %vm520_vm9 = vcmask 195712  }
 0x194   :  { %vm285_vm10 = vcmp.ge.f32.partialorder %v211_v36, %v998_v56  ;;  %vm286_vm11 = vcmp.ge.f32.partialorder %v213_v37, %v998_v56  ;;  %317 = vmin.xlane.f32.xlu1 %v996_v55  ;;  %v330_v58 = vshra.s32 %v1000_v57, 16  ;;  %v313_v36 = vand.u32 65535, %v988_v51  ;;  %v727_v37 = vpop.f32.mrf.mxu1 }
 0x195   :  { %v293_v59 = vsel %vm285_vm10, %v964_v39, 256  ;;  %v294_v60 = vsel %vm286_vm11, %v967_v40, 256  ;;  %v250_v46 = vadd.f32 %v249_v32, %v93_v35  ;;  %v329_v47 = vand.u32 65535, %v1000_v57 }
 0x196   :  { %v1008_v61 = vcvt.s32.f32 %v330_v58  ;;  %vm343_vm12 = vcmp.lt.s32.totalorder %v293_v59, %v294_v60  ;;  %v315_v43 = vcvt.s32.f32 %v313_v36  ;;  %v252_v45 = vpop.f32.mrf.mxu1  ;;  %v258_v16 = vadd.f32 %v726_v29, %v93_v35 }
 0x197   :  { %v1010_v62 = vsel %vm343_vm12, %v293_v59, %v294_v60  ;;  %v531_v51 = vmul.f32 %v250_v46, %v250_v46  ;;  %v331_v54 = vcvt.s32.f32 %v329_v47  ;;  %v261_v57 = vadd.f32 %v727_v37, %v93_v35 }
 0x198   :  { %333 = vmin.xlane.f32.xlu0 %v1008_v61  ;;  %v346_v63 = vshra.s32 %v1010_v62, 16  ;;  %v345_v52 = vand.u32 65535, %v1010_v62  ;;  %v533_v60 = vmul.f32 %v258_v16, %v258_v16  ;;  %v401_v62 = vld [vmem:[#allocation7 + $0x90] sm:$0xff]  ;;  %v522_v32 = vadd.s32 4294967272, %v964_v39 }
 0x199   :  { %v536_v1 = vsel %vm535_vm0, %v531_v51, 0.0  ;;  %700 = vmatprep.subr.mxu0 %v401_v62  ;;  %vm527_vm10 = vcmask 261312   ;;  %vm529_vm11 = vcmask 253952  }
 0x19a   :  { %v1014_v0 = vcvt.s32.f32 %v346_v63  ;;  %v347_v59 = vcvt.s32.f32 %v345_v52  ;;  %v542_v6 = vsel %vm535_vm0, %v533_v60, 0.0  ;;  %701 = vmatpush3.msra.mxu0 %v385_v3  ;;  %v525_v46 = vsub.s32 %v522_v32, %v953_v13 }
 0x19b   :  { %702 = vmatprep.subr.mxu0 %v400_v4 }
 0x19c   :  { %349 = vmin.xlane.f32.xlu1 %v1014_v0  ;;  %703 = vmatpush3.msra.mxu0 %v384_v7 }
 0x19d   :  { %704 = vmatprep.subr.mxu0 %v399_v8 }
 0x19e   :  { %705 = vmatpush3.msra.mxu0 %v383_v9 }
 0x219   :  { %v302_v33 = vpop.xlane.xlu0 %301 }
 0x21a   :  { %vm303_vm13 = vcmp.eq.f32.partialorder %v984_v49, %v302_v33  ;;  %v253_v49 = vadd.f32 %v252_v45, %v93_v35  ;;  %v308_v10 = vcvt.f32.s32 %v302_v33  ;;  %v518_v35 = vsub.s32 %v515_v26, %v953_v13 }
 0x21b   :  { %v304_v38 = vsel %vm303_vm13, %v299_v34, inf }
 0x21c   :  { %305 = vmin.xlane.f32.xlu0 %v304_v38  ;;  %v309_v14 = vshll.u32 %v308_v10, 16 }
 0x21d   :  { %v318_v42 = vpop.xlane.xlu1 %317 }
 0x21e   :  { %vm319_vm14 = vcmp.eq.f32.partialorder %v996_v55, %v318_v42  ;;  %v532_v55 = vmul.f32 %v253_v49, %v253_v49  ;;  %v324_v11 = vcvt.f32.s32 %v318_v42 }
 0x21f   :  { %v320_v48 = vsel %vm319_vm14, %v315_v43, inf }
 0x220   :  { %321 = vmin.xlane.f32.xlu1 %v320_v48  ;;  %v539_v5 = vsel %vm535_vm0, %v532_v55, 0.0  ;;  %v325_v20 = vshll.u32 %v324_v11, 16 }
 0x221   :  { %v334_v53 = vpop.xlane.xlu0 %333 }
 0x222   :  { %vm335_vm15 = vcmp.eq.f32.partialorder %v1008_v61, %v334_v53  ;;  %v534_v61 = vmul.f32 %v261_v57, %v261_v57  ;;  %v340_v18 = vcvt.f32.s32 %v334_v53  ;;  %v556_v57 = vmul.f32 2.0, %v969_v41 }
 0x223   :  { %v336_v58 = vsel %vm335_vm15, %v331_v54, inf }
 0x224   :  { %337 = vmin.xlane.f32.xlu0 %v336_v58  ;;  %v341_v27 = vshll.u32 %v340_v18, 16 }
 0x225   :  { %v350_v63 = vpop.xlane.xlu1 %349 }
 0x226   :  { %vm351_vm1 = vcmp.eq.f32.partialorder %v1014_v0, %v350_v63  ;;  %v545_v0 = vsel %vm535_vm0, %v534_v61, 0.0  ;;  %v356_v29 = vcvt.f32.s32 %v350_v63  ;;  %v559_v61 = vmul.f32 2.0, %v998_v56 }
 0x227   :  { %v352_v2 = vsel %vm351_vm1, %v347_v59, inf }
 0x228   :  { %353 = vmin.xlane.f32.xlu1 %v352_v2  ;;  %537 = vadd.xlane.f32.xlu0 %v536_v1  ;;  %v357_v38 = vshll.u32 %v356_v29, 16 }
 0x22c   :  { %540 = vadd.xlane.f32.xlu1 %v539_v5  ;;  %543 = vadd.xlane.f32.xlu0 %v542_v6 }
 0x230   :  { %546 = vadd.xlane.f32.xlu1 %v545_v0 }
 0x2a5   :  { %v306_v12 = vpop.xlane.xlu0 %305 }
 0x2a6   :  { %v307_v15 = vcvt.f32.s32 %v306_v12 }
 0x2a8   :  { %v310_v19 = vadd.s32 %v309_v14, %v307_v15 }
 0x2a9   :  { %v322_v22 = vpop.xlane.xlu1 %321 }
 0x2aa   :  { %v323_v24 = vcvt.f32.s32 %v322_v22  ;;  %vm360_vm2 = vcmp.eq.s32.totalorder %v967_v40, %v310_v19  ;;  %vm359_vm3 = vcmp.eq.s32.totalorder %v964_v39, %v310_v19  ;;  %v507_v30 = vrot.slane %v310_v19, %v1034_v21 }
 0x2ab   :  { %661 = vmatprep.mubr.msk.f32.mxu0 %vm360_vm2, %v902_v25 }
 0x2ac   :  { %v326_v28 = vadd.s32 %v325_v20, %v323_v24  ;;  %662 = vmatmul.mubr.msk.f32.vlgmr.msra.gmra.mxu0 %vm359_vm3, %v902_v25 }
 0x2ad   :  { %v338_v31 = vpop.xlane.xlu0 %337 }
 0x2ae   :  { %v512_v33 = vrot.slane %v326_v28, %v1037_v23  ;;  %v339_v34 = vcvt.f32.s32 %v338_v31  ;;  %vm362_vm5 = vcmp.eq.s32.totalorder %v967_v40, %v326_v28  ;;  %vm361_vm6 = vcmp.eq.s32.totalorder %v964_v39, %v326_v28 }
 0x2af   :  { %663 = vmatprep.mubr.msk.f32.mxu0 %vm362_vm5, %v902_v25 }
 0x2b0   :  { %v342_v36 = vadd.s32 %v341_v27, %v339_v34  ;;  %664 = vmatmul.mubr.msk.f32.gmra.mxu0 %vm361_vm6, %v902_v25  ;;  %v514_v37 = vsel %vm513_vm4, %v512_v33, %v507_v30 }
 0x2b1   :  { %v354_v42 = vpop.xlane.xlu1 %353  ;;  %v538_v43 = vpop.xlane.xlu0 %537 }
 0x2b2   :  { %v355_v47 = vcvt.f32.s32 %v354_v42  ;;  %v548_v45 = vadd.f32 1e-12, %v538_v43  ;;  %vm364_vm7 = vcmp.eq.s32.totalorder %v967_v40, %v342_v36  ;;  %v519_v48 = vrot.slane %v342_v36, %v518_v35 }
 0x2b3   :  { %665 = vmatprep.mubr.msk.f32.mxu0 %vm364_vm7, %v902_v25  ;;  %vm363_vm8 = vcmp.eq.s32.totalorder %v964_v39, %v342_v36 }
 0x2b4   :  { %v358_v52 = vadd.s32 %v357_v38, %v355_v47  ;;  %756 = vrsqrt.f32 %v548_v45  ;;  %666 = vmatmul.mubr.msk.f32.gmra.mxu0 %vm363_vm8, %v902_v25  ;;  %v521_v13 = vsel %vm520_vm9, %v519_v48, %v514_v37 }
 0x2b5   :  { %v541_v16 = vpop.xlane.xlu1 %540  ;;  %v544_v53 = vpop.xlane.xlu0 %543 }
 0x2b6   :  { %v526_v51 = vrot.slane %v358_v52, %v525_v46  ;;  %v549_v54 = vadd.f32 1e-12, %v541_v16  ;;  %v550_v49 = vadd.f32 1e-12, %v544_v53  ;;  %vm366_vm12 = vcmp.eq.s32.totalorder %v967_v40, %v358_v52 }
 0x2b7   :  { %667 = vmatprep.mubr.msk.f32.mxu0 %vm366_vm12, %v902_v25  ;;  %vm365_vm13 = vcmp.eq.s32.totalorder %v964_v39, %v358_v52  ;;  %v557_v40 = vmul.f32 2.0, %v975_v44  ;;  %v558_v39 = vmul.f32 2.0, %v986_v50 }
 0x2b8   :  { %758 = vrsqrt.f32 %v549_v54  ;;  %668 = vmatmul.mubr.msk.f32.gmra.mxu0 %vm365_vm13, %v902_v25  ;;  %v528_v58 = vsel %vm527_vm10, %v526_v51, %v521_v13 }
 0x2b9   :  { %760 = vrsqrt.f32 %v550_v49  ;;  %v547_v59 = vpop.xlane.xlu1 %546  ;;  %530 = vst.msk [vmem:[#allocation9] sm:$0x1] %vm529_vm11, %v528_v58 }
 0x2ba   :  { %v551_v60 = vadd.f32 1e-12, %v547_v59 }
 0x2bc   :  { %762 = vrsqrt.f32 %v551_v60 }
 0x2c1   :  { %v757_v63 = vpop.eup %756 }
 0x2c2   :  { %v560_v55 = vmul.f32 %v757_v63, %v556_v57 }
 0x2c4   :  { %v564_v2 = vsub.f32 2.0, %v560_v55 }
 0x2c5   :  { %v759_v1 = vpop.eup %758 }
 0x2c6   :  { %v761_v62 = vpop.eup %760  ;;  %v561_v3 = vmul.f32 %v759_v1, %v557_v40  ;;  %v575_v9 = vrot.slane %v564_v2, %v1034_v21 }
 0x2c7   :  { %v562_v4 = vmul.f32 %v761_v62, %v558_v39 }
 0x2c8   :  { %v565_v5 = vsub.f32 2.0, %v561_v3 }
 0x2c9   :  { %v763_v6 = vpop.eup %762  ;;  %v566_v7 = vsub.f32 2.0, %v562_v4 }
 0x2ca   :  { %v563_v8 = vmul.f32 %v763_v6, %v559_v61  ;;  %v579_v41 = vrot.slane %v565_v5, %v1037_v23 }
 0x2cb   :  { %v584_v0 = vrot.slane %v566_v7, %v518_v35 }
 0x2cc   :  { %v567_v10 = vsub.f32 2.0, %v563_v8  ;;  %v580_v44 = vsel %vm513_vm4, %v579_v41, %v575_v9 }
 0x2cd   :  { %v585_v50 = vsel %vm520_vm9, %v584_v0, %v580_v44 }
 0x2ce   :  { %v589_v11 = vrot.slane %v567_v10, %v525_v46 }
 0x2d0   :  { %v590_v12 = vsel %vm527_vm10, %v589_v11, %v585_v50 }
 0x2d1   :  { %592 = vst.msk [vmem:[#allocation11] sm:$0x1] %vm529_vm11, %v590_v12 }
 0x2d2   :  { %835 = shalt.err (!%p832_p5)
}
 0x2d3   :  { %614 = dma.vmem_to_hbm [thread:$0]  %s612_s17, 16, %s1084_s5, [#allocation10]  }
 0x2d4   :  { %s904_s22 = smov [#allocation11]  }
 0x2d5   :  { %s621_s23 = sshll.u32 %s904_s22, 4  ;;  %s622_s23 = int_to_ptr.vmem [resolvable:$true] %s621_s23 }
 0x2d6   :  { %s844_s24 = scalar_lea.vmem %s622_s23, 16  ;;  %s848_s25 = scalar_lea.vmem %s622_s23, 32 }
 0x2d7   :  { %p845_p6 = scmp.ne.s32.totalorder %s622_s23, %s844_s24  ;;  %p849_p7 = scmp.lt.s32.totalorder %s622_s23, %s622_s23 }
 0x2d8   :  { %p850_p8 = scmp.lt.s32.totalorder %s848_s25, %s844_s24 }
 0x2da   :  { %p851_p9 = por %p850_p8, %p849_p7 }
 0x2dc   :  { %p852_p10 = pnand %p851_p9, %p845_p6 }
 0x2de   :  { %855 = shalt.err (!%p852_p10)
}
 0x2df   :  { %624 = dma.vmem_to_hbm [thread:$0]  %s622_s23, 16, %s1085_s6, [#allocation10]  }
 0x2e0   :  { %s905_s5 = smov [#allocation8]  }
 0x2e1   :  { %s598_s28 = sshll.u32 %s905_s5, 4  ;;  %s599_s28 = int_to_ptr.vmem [resolvable:$true] %s598_s28 }
 0x2e2   :  { %s864_s6 = scalar_lea.vmem %s599_s28, 512  ;;  %p869_p12 = scmp.lt.s32.totalorder %s599_s28, %s599_s28 }
 0x2e3   :  { %p865_p11 = scmp.ne.s32.totalorder %s599_s28, %s864_s6  ;;  %p870_p13 = scmp.lt.s32.totalorder %s864_s6, %s864_s6 }
 0x2e5   :  { %p871_p0 = por %p870_p13, %p869_p12 }
 0x2e7   :  { %p872_p1 = pnand %p871_p0, %p865_p11 }
 0x36c   :  { %v706_v56 = vpop.f32.mrf.mxu0 }
 0x36e   :  { %v707_v14 = vpop.f32.mrf.mxu0 }
 0x36f   :  { %v708_v15 = vadd.f32 %v707_v14, %v706_v56 }
 0x370   :  { %v709_v17 = vpop.f32.mrf.mxu0 }
 0x371   :  { %500 = vst [vmem:[#allocation8] sm:$0xff] %v708_v15 }
 0x372   :  { %v710_v18 = vpop.f32.mrf.mxu0 }
 0x373   :  { %v711_v19 = vadd.f32 %v710_v18, %v709_v17 }
 0x374   :  { %v712_v20 = vpop.f32.mrf.mxu0 }
 0x375   :  { %501 = vst [vmem:[#allocation8 + $0x8] sm:$0xff] %v711_v19 }
 0x376   :  { %v713_v21 = vpop.f32.mrf.mxu0 }
 0x377   :  { %v714_v22 = vadd.f32 %v713_v21, %v712_v20 }
 0x378   :  { %v715_v23 = vpop.f32.mrf.mxu0 }
 0x379   :  { %502 = vst [vmem:[#allocation8 + $0x10] sm:$0xff] %v714_v22 }
 0x37a   :  { %v716_v24 = vpop.f32.mrf.mxu0 }
 0x37b   :  { %v717_v25 = vadd.f32 %v716_v24, %v715_v23 }
 0x37d   :  { %503 = vst [vmem:[#allocation8 + $0x18] sm:$0xff] %v717_v25 }
 0x37e   :  { %875 = shalt.err (!%p872_p1)
}
 0x37f   :  { %604 = dma.vmem_to_hbm [thread:$0]  %s599_s28, 512, %s1083_s4, [#allocation4], %s899_s13, %s899_s13, %s900_s14  }
 0x380   :  { %888 = dma.done.wait [#allocation4], 512  }
 0x381   :  { %889 = vsyncadd [#allocation4], 4294966784 }
 0x382   :  { %890 = dma.done.wait [#allocation10], 32  }
 0x383   :  { %891 = vsyncadd [#allocation10], 4294967264 }
 0x384   :  { %634 = vsyncpa [#allocation3], 1 }
 0x385   :  { %635 = vsyncpa [#allocation6], 1 }
 0x386   :  { %636 = vsyncpa [#allocation4], 1 }
 0x387   :  { %637 = vsyncpa [#allocation10], 1 }

</bundles_post_ra>
